<compile_context>
chip_gen: v7x
topology: tpu7x:2x2x1
jax: 0.10.0
libtpu: 0.0.40
codegen_flags: <defaults>
</compile_context>

<pallas_src>
import functools
import math

import jax
import jax.numpy as jnp
from jax.experimental import pallas as pl
from jax.experimental.pallas import tpu as pltpu


def _round_up(n: int, m: int) -> int:
    return (n + m - 1) // m * m


def _sinusoidal_pos_emb_kernel(x_ref, freq_ref, phase_ref, out_ref):
    """x_ref: (TILE_B, 1); freq_ref/phase_ref: (1, Dp); out_ref: (TILE_B, Dp).

    One broadcast FMA + one sin per element; sin(a + pi/2) == cos(a) covers the
    cos half.  Zero-padded lanes have freq = phase = 0 -> sin(0) = 0 and are
    sliced off by the wrapper.
    """
    x = x_ref[...].astype(jnp.float32)                         # (TILE_B, 1)
    out_ref[...] = jnp.sin(x * freq_ref[...] + phase_ref[...]).astype(out_ref.dtype)


def _choose_tiling(b: int, dp: int) -> tuple[int, int]:
    """Pick (tile_b, padded_b): bounded pad waste, VMEM-safe, megacore-friendly."""
    # Budget for the double-buffered output tile (inputs are a few KB).
    budget_bytes = 8 << 20
    cap = budget_bytes // (2 * dp * 4)            # rows per tile under budget
    cap = max(8, min(1024, (cap // 8) * 8))
    steps = pl.cdiv(b, cap)
    # v7x has 2 TensorCores: give each work when the batch is large enough
    # that per-step overhead (~0.35 us) is negligible.
    if b >= 2048:
        steps = max(steps, 2)
    tile_b = _round_up(pl.cdiv(b, steps), 8)
    return tile_b, steps * tile_b


@functools.partial(jax.jit, static_argnames=("dim",))
def sinusoidal_pos_emb(x, dim: int):
    """Mirrors SinusoidalPosEmb.forward for a 1-D tensor of timesteps."""
    x = jnp.asarray(x).reshape(-1)
    b = x.shape[0]
    half_dim = dim // 2

    # Degenerate-dim branches (match the PyTorch module; no kernel needed).
    if dim <= 1:
        if dim == 1:
            return x.astype(jnp.float32)[:, None]
        return jnp.zeros((b, 0), jnp.float32)

    # div_term exactly as in the spec (note the 1e-6, not "half_dim - 1").
    div_term = jnp.exp(
        jnp.arange(half_dim, dtype=jnp.float32)
        * -(math.log(10000.0) / (half_dim - 1e-6))
    )

    # Lane-dense rows: freq = [div_term | div_term | 0-pad], phase = [0 | pi/2 | 0-pad].
    out_w = 2 * half_dim                      # PyTorch output width (dim or dim-1)
    dp = max(128, _round_up(out_w, 128))      # padded to a multiple of 128 lanes
    freq = jnp.zeros((1, dp), jnp.float32)
    freq = freq.at[0, :half_dim].set(div_term)
    freq = freq.at[0, half_dim:out_w].set(div_term)
    phase = jnp.zeros((1, dp), jnp.float32).at[0, half_dim:out_w].set(jnp.pi / 2)

    tile_b, bp = _choose_tiling(b, dp)
    xf = x.astype(jnp.float32)[:, None]
    x2 = xf if bp == b else jnp.pad(xf, ((0, bp - b), (0, 0)))   # skip pad when aligned

    out = pl.pallas_call(
        _sinusoidal_pos_emb_kernel,
        out_shape=jax.ShapeDtypeStruct((bp, dp), jnp.float32),
        grid=(bp // tile_b,),
        in_specs=[
            pl.BlockSpec((tile_b, 1), lambda i: (i, 0)),   # timesteps, tiled
            pl.BlockSpec((1, dp), lambda i: (0, 0)),       # freq row, VMEM-resident
            pl.BlockSpec((1, dp), lambda i: (0, 0)),       # phase row, VMEM-resident
        ],
        out_specs=pl.BlockSpec((tile_b, dp), lambda i: (i, 0)),
        compiler_params=pltpu.CompilerParams(
            dimension_semantics=("parallel",),             # megacore on v7x
        ),
    )(x2, freq, phase)

    # Skip the slice entirely when no padding was added.
    if bp == b and out_w == dp:
        return out
    return out[:b, :out_w]
    # TODO(synk): for tiny batches (e.g. 64 diffusion timesteps) this op is a
    # few KB; fusing it into the downstream time-MLP kernel would remove the
    # standalone launch + intermediate HBM round trip.


def _reference(x, dim: int):
    """Pure-JAX reference mirroring the PyTorch forward (sin/cos concat)."""
    x = jnp.asarray(x).reshape(-1).astype(jnp.float32)
    half_dim = dim // 2
    if dim <= 1:
        if dim == 1:
            return x[:, None]
        return jnp.zeros((x.shape[0], 0), jnp.float32)
    div_term = jnp.exp(
        jnp.arange(half_dim, dtype=jnp.float32)
        * -(math.log(10000.0) / (half_dim - 1e-6))
    )
    emb = x[:, None] * div_term[None, :]
    emb = jnp.concatenate([jnp.sin(emb), jnp.cos(emb)], axis=-1)
    return emb[:, :dim]


if __name__ == "__main__":
    key = jax.random.PRNGKey(0)
    k1, k2, k3 = jax.random.split(key, 3)
    # Tolerance note: sin(theta + pi/2) vs cos(theta) differ by the f32
    # rounding of the argument sum (~half an ulp of theta ~ 6e-5 at theta=1e3).
    atol = 5e-4

    # Primary case: lane-dense dim, small batch of diffusion timesteps.
    batch, dim = 64, 128
    x = jax.random.uniform(k1, (batch,), jnp.float32, minval=0.0, maxval=1000.0)
    out = jax.block_until_ready(sinusoidal_pos_emb(x, dim))
    ref = _reference(x, dim)
    assert out.shape == (batch, dim), out.shape
    assert jnp.allclose(out, ref, atol=atol, rtol=1e-4), "mismatch (dim=128)"

    # Non-128-multiple dim exercising lane padding + slice.
    dim2 = 30
    x2 = jax.random.uniform(k2, (batch,), jnp.float32, minval=0.0, maxval=1000.0)
    out2 = jax.block_until_ready(sinusoidal_pos_emb(x2, dim2))
    ref2 = _reference(x2, dim2)
    assert out2.shape == (batch, dim2), out2.shape
    assert jnp.allclose(out2, ref2, atol=atol, rtol=1e-4), "mismatch (dim=30)"

    # Non-8-multiple batch exercising the (minimal) batch-pad path.
    batch3, dim3 = 13, 30
    x3 = jax.random.uniform(k3, (batch3,), jnp.float32, minval=0.0, maxval=1000.0)
    out3 = jax.block_until_ready(sinusoidal_pos_emb(x3, dim3))
    ref3 = _reference(x3, dim3)
    assert out3.shape == (batch3, dim3), out3.shape
    assert jnp.allclose(out3, ref3, atol=atol, rtol=1e-4), "mismatch (batch=13)"

    print("KERNEL_OK")
</pallas_src>

<mosaic_0001>
module attributes {stable_mosaic.version = 11 : i64} {
  func.func @_sinusoidal_pos_emb_kernel(%arg0: i32, %arg1: memref<64x1xf32, #tpu.memory_space<vmem>>, %arg2: memref<1x128xf32, #tpu.memory_space<vmem>>, %arg3: memref<1x128xf32, #tpu.memory_space<vmem>>, %arg4: memref<64x128xf32, #tpu.memory_space<vmem>>) attributes {dimension_semantics = [#tpu.dimension_semantics<parallel>], iteration_bounds = array<i64: 1>, scalar_prefetch = 0 : i64, scratch_operands = 0 : i64, tpu.core_type = #tpu.core_type<tc>, window_params = [{transform_indices = @transform_0, window_bounds = array<i64: 64, 1>}, {pipeline_mode = #tpu.pipeline_mode<synchronous>, transform_indices = @transform_1, window_bounds = array<i64: 1, 128>}, {pipeline_mode = #tpu.pipeline_mode<synchronous>, transform_indices = @transform_2, window_bounds = array<i64: 1, 128>}, {transform_indices = @transform_3, window_bounds = array<i64: 64, 128>}]} {
    %c0 = arith.constant 0 : index
    %c0_0 = arith.constant 0 : index
    %0 = vector.load %arg1[%c0, %c0_0] : memref<64x1xf32, #tpu.memory_space<vmem>>, vector<64x1xf32>
    %c0_1 = arith.constant 0 : index
    %c0_2 = arith.constant 0 : index
    %1 = vector.load %arg2[%c0_1, %c0_2] : memref<1x128xf32, #tpu.memory_space<vmem>>, vector<1x128xf32>
    %2 = vector.broadcast %0 : vector<64x1xf32> to vector<64x128xf32>
    %3 = vector.broadcast %1 : vector<1x128xf32> to vector<64x128xf32>
    %4 = arith.mulf %2, %3 : vector<64x128xf32>
    %c0_3 = arith.constant 0 : index
    %c0_4 = arith.constant 0 : index
    %5 = vector.load %arg3[%c0_3, %c0_4] : memref<1x128xf32, #tpu.memory_space<vmem>>, vector<1x128xf32>
    %6 = vector.broadcast %5 : vector<1x128xf32> to vector<64x128xf32>
    %7 = arith.addf %4, %6 : vector<64x128xf32>
    %8 = math.sin %7 : vector<64x128xf32>
    %c0_5 = arith.constant 0 : index
    %c0_6 = arith.constant 0 : index
    %9 = vector.load %arg4[%c0_5, %c0_6] : memref<64x128xf32, #tpu.memory_space<vmem>>, vector<64x128xf32>
    tpu.vector_store %arg4[%c0_5, %c0_6], %8 {strides = array<i32>} : memref<64x128xf32, #tpu.memory_space<vmem>>, vector<64x128xf32>,
    return
  }
  func.func @transform_0(%arg0: i32) -> (i32, i32) {
    %c0_i32 = arith.constant 0 : i32
    %c0_i32_0 = arith.constant 0 : i32
    return %arg0, %c0_i32 : i32, i32
  }
  func.func @transform_1(%arg0: i32) -> (i32, i32) {
    %c0_i32 = arith.constant 0 : i32
    %c0_i32_0 = arith.constant 0 : i32
    %c0_i32_1 = arith.constant 0 : i32
    return %c0_i32, %c0_i32_0 : i32, i32
  }
  func.func @transform_2(%arg0: i32) -> (i32, i32) {
    %c0_i32 = arith.constant 0 : i32
    %c0_i32_0 = arith.constant 0 : i32
    %c0_i32_1 = arith.constant 0 : i32
    return %c0_i32, %c0_i32_0 : i32, i32
  }
  func.func @transform_3(%arg0: i32) -> (i32, i32) {
    %c0_i32 = arith.constant 0 : i32
    %c0_i32_0 = arith.constant 0 : i32
    return %arg0, %c0_i32 : i32, i32
  }
}

</mosaic_0001>

<bundles_post_ra>
// kernel: sinusoidal_pos_emb.1
= control target key start
LH: loop header
LB: loop body
LE: loop exit
PB: predicated region body
PF: predicated region fallthrough
CT: control target
= control target key end

     0   :  { %v1085_v2 = vmov 0   ;;  %s1782_s0 = inlined_call_operand.vmem [shape: f32[64,1], index: 0, kind: input, shape index: {}]   ;;  %s1783_s1 = inlined_call_operand.vmem [shape: f32[1,128], index: 1, kind: input, shape index: {}]   ;;  %s1784_s2 = inlined_call_operand.vmem [shape: f32[1,128], index: 2, kind: input, shape index: {}]   ;;  %s1785_s3 = inlined_call_operand.hbm [shape: f32[64,128], index: 3, kind: output, shape index: {}]  }
   0x1   :  { %v17_v0 = vld [vmem:[%s1782_s0 + $0x10] sm:$0xff]  ;;  %v15_v1 = vld [vmem:[%s1782_s0] sm:$0xff]  ;;  %1026 = vset.pattern.permute.xlu1 %v1085_v2  ;;  %1025 = vset.pattern.permute.xlu0 %v1085_v2  ;;  %v18_v3 = vld [vmem:[%s1782_s0 + $0x18] sm:$0xff] }
   0x2   :  { %36 = vperm.xlu1 %1026, %v17_v0   ;;  %26 = vperm.xlu0 %1025, %v15_v1   ;;  %v16_v4 = vld [vmem:[%s1782_s0 + $0x8] sm:$0xff] }
   0x3   :  { %8 = vsyncpa [#allocation3], 0  ;;  %v20_v5 = vld [vmem:[%s1782_s0 + $0x28] sm:$0xff]  ;;  %v19_v6 = vld [vmem:[%s1782_s0 + $0x20] sm:$0xff]  ;;  %v1086_v47 = vmov 683565275  }
   0x4   :  { %v22_v7 = vld [vmem:[%s1782_s0 + $0x38] sm:$0xff]  ;;  %v21_v8 = vld [vmem:[%s1782_s0 + $0x30] sm:$0xff]  ;;  %v1142_v9 = vld [vmem:[%s1783_s1] ss:$0 sm:$0xff]  ;;  %v1087_v51 = vmov 2475754826  }
   0x5   :  { %v1147_v10 = vld [vmem:[%s1784_s2] ss:$0 sm:$0xff]  ;;  %v1088_v53 = vmov 2131351028   ;;  %v1089_v55 = vmov 2102212464  }
   0x6   :  { %41 = vperm.xlu1 %1026, %v18_v3   ;;  %31 = vperm.xlu0 %1025, %v16_v4   ;;  %v1090_v57 = vmov 920167782   ;;  %v1091_v0 = vmov 1326507024  }
   0xa   :  { %51 = vperm.xlu1 %1026, %v20_v5   ;;  %46 = vperm.xlu0 %1025, %v19_v6  }
   0xe   :  { %61 = vperm.xlu1 %1026, %v22_v7   ;;  %56 = vperm.xlu0 %1025, %v21_v8  }
  0x81   :  { %v37_v11 = vpop.permute.xlu1 %36  ;;  %v27_v12 = vpop.permute.xlu0 %26 }
  0x82   :  { %v72_v13 = vmul.f32 %v1142_v9, %v37_v11  ;;  %v70_v14 = vmul.f32 %v1142_v9, %v27_v12 }
  0x84   :  { %v1152_v15 = vadd.f32 %v1147_v10, %v72_v13  ;;  %v1155_v16 = vadd.f32 %v1147_v10, %v70_v14 }
  0x85   :  { %v42_v17 = vpop.permute.xlu1 %41  ;;  %v32_v35 = vpop.permute.xlu0 %31 }
  0x86   :  { %v301_v18 = vand.u32 2147483647, %v1152_v15  ;;  %v304_v19 = vand.u32 2139095040, %v1152_v15  ;;  %v93_v20 = vand.u32 2147483647, %v1155_v16  ;;  %v96_v21 = vand.u32 2139095040, %v1155_v16 }
  0x87   :  { %v73_v23 = vmul.f32 %v1142_v9, %v42_v17  ;;  %v1171_v41 = vmul.f32 %v1142_v9, %v32_v35  ;;  %vm303_vm13 = vcmp.lt.s32.totalorder %v1152_v15, 0  ;;  %vm95_vm14 = vcmp.lt.s32.totalorder %v1155_v16, 0 }
  0x88   :  { %v305_v22 = vshrl.u32 %v304_v19, 23  ;;  %v308_v24 = vand.u32 8388607, %v301_v18  ;;  %v97_v25 = vshrl.u32 %v96_v21, 23  ;;  %v100_v26 = vand.u32 8388607, %v93_v20 }
  0x89   :  { %v1167_v28 = vadd.f32 %v1147_v10, %v73_v23 }
  0x8a   :  { %v959_v27 = vadd.s32 4294967169, %v305_v22  ;;  %v951_v29 = vadd.s32 4294967169, %v97_v25  ;;  %v309_v31 = vor.u32 8388608, %v308_v24  ;;  %v101_v32 = vor.u32 8388608, %v100_v26 }
  0x8b   :  { %v408_v34 = vand.u32 2139095040, %v1167_v28  ;;  %v405_v45 = vand.u32 2147483647, %v1167_v28 }
  0x8c   :  { %v311_v30 = vadd.s32 1, %v959_v27  ;;  %v103_v33 = vadd.s32 1, %v951_v29  ;;  %v1173_v42 = vshll.u32 %v309_v31, 8  ;;  %v1177_v44 = vshll.u32 %v101_v32, 8 }
  0x8d   :  { %v409_v37 = vshrl.u32 %v408_v34, 23 }
  0x8e   :  { %vm312_vm0 = vcmp.gt.s32.totalorder %v311_v30, 0  ;;  %vm104_vm1 = vcmp.gt.s32.totalorder %v103_v33, 0 }
  0x8f   :  { %v313_v36 = vsel %vm312_vm0, %v311_v30, 0  ;;  %v105_v40 = vsel %vm104_vm1, %v103_v33, 0  ;;  %v1181_v50 = vadd.s32 4294967169, %v409_v37  ;;  %vm1289_vm1 = vcmp.le.f32.partialorder %v301_v18, 0.7853982 }
  0x90   :  { %v314_v38 = vshrl.u32 %v313_v36, 5  ;;  %v315_v39 = vand.u32 31, %v313_v36  ;;  %v1175_v43 = vshrl.u32 %v105_v40, 5  ;;  %v107_v49 = vand.u32 31, %v105_v40 }
  0x92   :  { %v316_v46 = vsub.s32 32, %v315_v39  ;;  %v318_v48 = vshll.u32 %v1086_v47, %v315_v39  ;;  %v321_v52 = vshll.u32 %v1087_v51, %v315_v39  ;;  %v324_v54 = vshll.u32 %v1088_v53, %v315_v39 }
  0x93   :  { %v327_v56 = vshll.u32 %v1089_v55, %v315_v39  ;;  %v330_v58 = vshll.u32 %v1090_v57, %v315_v39  ;;  %vm333_vm2 = vcmp.lt.s32.totalorder %v314_v38, 1  ;;  %vm334_vm3 = vcmp.lt.s32.totalorder %v314_v38, 2 }
  0x94   :  { %v319_v59 = vshrl.u32 %v1087_v51, %v316_v46  ;;  %v322_v60 = vshrl.u32 %v1088_v53, %v316_v46  ;;  %v325_v61 = vshrl.u32 %v1089_v55, %v316_v46  ;;  %v317_v62 = vshrl.u32 %v1086_v47, %v316_v46 }
  0x95   :  { %v328_v63 = vshrl.u32 %v1090_v57, %v316_v46  ;;  %v331_v1 = vshrl.u32 %v1091_v0, %v316_v46  ;;  %v108_v5 = vsub.s32 32, %v107_v49  ;;  %vm335_vm4 = vcmp.lt.s32.totalorder %v314_v38, 3 }
  0x96   :  { %v320_v2 = vor.u32 %v319_v59, %v318_v48  ;;  %v323_v3 = vor.u32 %v322_v60, %v321_v52  ;;  %v326_v4 = vor.u32 %v325_v61, %v324_v54  ;;  %vm336_vm5 = vcmp.lt.s32.totalorder %v314_v38, 4 }
  0x97   :  { %v329_v6 = vor.u32 %v328_v63, %v327_v56  ;;  %v332_v7 = vor.u32 %v331_v1, %v330_v58  ;;  %v110_v21 = vshll.u32 %v1086_v47, %v107_v49  ;;  %v111_v24 = vshrl.u32 %v1087_v51, %v108_v5 }
  0x98   :  { %v337_v8 = vsel %vm333_vm2, %v317_v62, %v320_v2  ;;  %v338_v11 = vsel %vm336_vm5, %v326_v4, 2102212464  ;;  %v341_v12 = vsel %vm333_vm2, %v320_v2, %v323_v3  ;;  %v345_v13 = vsel %vm333_vm2, %v323_v3, %v326_v4 }
  0x99   :  { %v339_v14 = vsel %vm335_vm4, %v323_v3, %v338_v11  ;;  %v342_v17 = vsel %vm336_vm5, %v329_v6, 920167782  ;;  %v346_v19 = vsel %vm336_vm5, %v332_v7, 1326507024  ;;  %v113_v25 = vshll.u32 %v1087_v51, %v107_v49 }
  0x9a   :  { %v343_v22 = vsel %vm335_vm4, %v326_v4, %v342_v17  ;;  %v347_v23 = vsel %vm335_vm4, %v329_v6, %v346_v19  ;;  %v340_v26 = vsel %vm334_vm3, %v337_v8, %v339_v14  ;;  %v114_v30 = vshrl.u32 %v1088_v53, %v108_v5 }
  0x9b   :  { %v344_v27 = vsel %vm334_vm3, %v341_v12, %v343_v22  ;;  %v348_v29 = vsel %vm334_vm3, %v345_v13, %v347_v23  ;;  %v112_v35 = vor.u32 %v111_v24, %v110_v21  ;;  %v116_v37 = vshll.u32 %v1088_v53, %v107_v49 }
  0x9c   :  { %v1204_v31 = vmul.u32.u64.low %v1173_v42, %v348_v29  ;;  %v1205_v32 = vmul.u32.u64.high %v1173_v42, %v348_v29, %v1204_v31  ;;  %v1208_v33 = vmul.u32.u64.low %v1173_v42, %v344_v27  ;;  %v1209_v34 = vmul.u32.u64.high %v1173_v42, %v344_v27, %v1208_v33 }
  0x9d   :  { %v115_v36 = vor.u32 %v114_v30, %v113_v25  ;;  %v117_v39 = vshrl.u32 %v1089_v55, %v108_v5  ;;  %v109_v40 = vshrl.u32 %v1086_v47, %v108_v5  ;;  %v119_v38 = vshll.u32 %v1089_v55, %v107_v49 }
  0x9e   :  { %v120_v46 = vshrl.u32 %v1090_v57, %v108_v5  ;;  %v123_v48 = vshrl.u32 %v1091_v0, %v108_v5  ;;  %v356_v52 = vmul.u32 %v1173_v42, %v340_v26  ;;  %v122_v56 = vshll.u32 %v1090_v57, %v107_v49 }
  0x9f   :  { %v118_v54 = vor.u32 %v117_v39, %v116_v37  ;;  %vm125_vm6 = vcmp.lt.s32.totalorder %v1175_v43, 1  ;;  %vm358_vm7 = vc.u32 %v1205_v32, %v1208_v33  ;;  %v359_v58 = vadd.s32 1, %v1209_v34 }
  0xa0   :  { %v121_v59 = vor.u32 %v120_v46, %v119_v38  ;;  %vm126_vm8 = vcmp.lt.s32.totalorder %v1175_v43, 2  ;;  %v124_v60 = vor.u32 %v123_v48, %v122_v56  ;;  %vm127_vm9 = vcmp.lt.s32.totalorder %v1175_v43, 3 }
  0xa1   :  { %vm128_vm10 = vcmp.lt.s32.totalorder %v1175_v43, 4  ;;  %v133_v61 = vsel %vm125_vm6, %v112_v35, %v115_v36  ;;  %v360_v42 = vsel %vm358_vm7, %v359_v58, %v1209_v34  ;;  %v137_v49 = vsel %vm125_vm6, %v115_v36, %v118_v54  ;;  %v52_v34 = vpop.permute.xlu1 %51 }
  0xa2   :  { %v130_v62 = vsel %vm128_vm10, %v118_v54, 2102212464  ;;  %v134_v63 = vsel %vm128_vm10, %v121_v59, 920167782  ;;  %v361_v1 = vadd.s32 %v360_v42, %v356_v52  ;;  %v129_v2 = vsel %vm125_vm6, %v109_v40, %v112_v35 }
  0xa3   :  { %v135_v3 = vsel %vm127_vm9, %v118_v54, %v134_v63  ;;  %v138_v4 = vsel %vm128_vm10, %v124_v60, 1326507024  ;;  %v131_v5 = vsel %vm127_vm9, %v115_v36, %v130_v62  ;;  %v415_v8 = vadd.s32 1, %v1181_v50 }
  0xa4   :  { %v136_v6 = vsel %vm126_vm8, %v133_v61, %v135_v3  ;;  %v139_v7 = vsel %vm127_vm9, %v121_v59, %v138_v4  ;;  %v362_v11 = vadd.s32 536870912, %v361_v1  ;;  %v412_v21 = vand.u32 8388607, %v405_v45 }
  0xa5   :  { %v140_v12 = vsel %vm126_vm8, %v137_v49, %v139_v7  ;;  %v1232_v13 = vmul.u32.u64.low %v1177_v44, %v136_v6  ;;  %v1233_v14 = vmul.u32.u64.high %v1177_v44, %v136_v6, %v1232_v13  ;;  %vm416_vm11 = vcmp.gt.s32.totalorder %v415_v8, 0 }
  0xa6   :  { %v1237_v17 = vmul.u32.u64.low %v1177_v44, %v140_v12  ;;  %v1238_v19 = vmul.u32.u64.high %v1177_v44, %v140_v12, %v1237_v17  ;;  %v363_v22 = vshrl.u32 %v362_v11, 30  ;;  %v132_v50 = vsel %vm126_vm8, %v129_v2, %v131_v5 }
  0xa7   :  { %v417_v23 = vsel %vm416_vm11, %v415_v8, 0  ;;  %v151_v26 = vadd.s32 1, %v1233_v14  ;;  %v1247_v27 = vadd.f32 %v1147_v10, %v1171_v41  ;;  %v148_v29 = vmul.u32 %v1177_v44, %v132_v50 }
  0xa8   :  { %v419_v24 = vand.u32 31, %v417_v23  ;;  %v364_v25 = vshll.u32 %v363_v22, 30  ;;  %vm150_vm12 = vc.u32 %v1238_v19, %v1232_v13  ;;  %v413_v30 = vor.u32 8388608, %v412_v21 }
  0xa9   :  { %v152_v43 = vsel %vm150_vm12, %v151_v26, %v1233_v14  ;;  %v357_v37 = vadd.s32 %v1208_v33, %v1205_v32  ;;  %v197_v39 = vand.u32 2147483647, %v1247_v27  ;;  %v1260_v44 = vmul.f32 %v1142_v9, %v52_v34 }
  0xaa   :  { %v420_v31 = vsub.s32 32, %v419_v24  ;;  %v1252_v35 = vsub.s32 %v361_v1, %v364_v25  ;;  %v153_v36 = vadd.s32 %v152_v43, %v148_v29  ;;  %v1263_v46 = vshll.u32 %v413_v30, 8 }
  0xab   :  { %v200_v48 = vand.u32 2139095040, %v1247_v27  ;;  %v1267_v54 = vshrl.u32 %v417_v23, 5  ;;  %v387_v56 = vsub.s32 4, %v363_v22  ;;  %v422_v59 = vshll.u32 %v1086_v47, %v419_v24 }
  0xac   :  { %v367_v41 = vsub.s32 0, %v1252_v35  ;;  %v154_v40 = vadd.s32 536870912, %v153_v36  ;;  %v423_v38 = vshrl.u32 %v1087_v51, %v420_v31  ;;  %v426_v32 = vshrl.u32 %v1088_v53, %v420_v31 }
  0xad   :  { %v429_v33 = vshrl.u32 %v1089_v55, %v420_v31  ;;  %v432_v60 = vshrl.u32 %v1090_v57, %v420_v31  ;;  %v425_v42 = vshll.u32 %v1087_v51, %v419_v24  ;;  %v428_v62 = vshll.u32 %v1088_v53, %v419_v24 }
  0xae   :  { %v960_v52 = vmin.u32 %v367_v41, %v1252_v35  ;;  %v155_v58 = vshrl.u32 %v154_v40, 30  ;;  %v435_v63 = vshrl.u32 %v1091_v0, %v420_v31  ;;  %v424_v1 = vor.u32 %v423_v38, %v422_v59 }
  0xaf   :  { %v431_v2 = vshll.u32 %v1089_v55, %v419_v24  ;;  %v201_v3 = vshrl.u32 %v200_v48, 23  ;;  %v427_v5 = vor.u32 %v426_v32, %v425_v42  ;;  %v430_v6 = vor.u32 %v429_v33, %v428_v62 }
  0xb0   :  { %v369_v61 = vclz %v960_v52  ;;  %v156_v49 = vshll.u32 %v155_v58, 30  ;;  %v434_v7 = vshll.u32 %v1090_v57, %v419_v24  ;;  %v1280_v8 = vsel %vm303_vm13, %v387_v56, %v363_v22 }
  0xb1   :  { %v421_v12 = vshrl.u32 %v1086_v47, %v420_v31  ;;  %v433_v14 = vor.u32 %v432_v60, %v431_v2  ;;  %v179_v17 = vsub.s32 4, %v155_v58  ;;  %vm437_vm0 = vcmp.lt.s32.totalorder %v1267_v54, 1 }
  0xb2   :  { %v961_v4 = vadd.s32 4294967294, %v369_v61  ;;  %v1283_v11 = vsub.s32 %v153_v36, %v156_v49  ;;  %v436_v21 = vor.u32 %v435_v63, %v434_v7  ;;  %vm439_vm2 = vcmp.lt.s32.totalorder %v1267_v54, 3 }
  0xb3   :  { %vm440_vm3 = vcmp.lt.s32.totalorder %v1267_v54, 4  ;;  %vm1298_vm4 = vcmp.le.f32.partialorder %v93_v20, 0.7853982  ;;  %v445_v18 = vsel %vm437_vm0, %v424_v1, %v427_v5  ;;  %v449_v43 = vsel %vm437_vm0, %v427_v5, %v430_v6 }
  0xb4   :  { %vm962_vm15 = vcmp.lt.s32.totalorder %v961_v4, 0  ;;  %v159_v23 = vsub.s32 0, %v1283_v11  ;;  %v442_v29 = vsel %vm440_vm3, %v430_v6, 2102212464  ;;  %v446_v34 = vsel %vm440_vm3, %v433_v14, 920167782 }
  0xb5   :  { %v372_v22 = vsel %vm962_vm15, 0, %v961_v4  ;;  %v447_v20 = vsel %vm439_vm2, %v430_v6, %v446_v34  ;;  %v450_v40 = vsel %vm440_vm3, %v436_v21, 1326507024  ;;  %vm438_vm5 = vcmp.lt.s32.totalorder %v1267_v54, 2 }
  0xb6   :  { %v373_v24 = vsub.s32 32, %v372_v22  ;;  %v377_v25 = vsub.s32 4294967266, %v372_v22  ;;  %v374_v30 = vshll.u32 %v1252_v35, %v372_v22  ;;  %v952_v31 = vmin.u32 %v159_v23, %v1283_v11 }
  0xb7   :  { %v441_v48 = vsel %vm437_vm0, %v421_v12, %v424_v1  ;;  %v443_v35 = vsel %vm439_vm2, %v427_v5, %v442_v29  ;;  %v448_v33 = vsel %vm438_vm5, %v445_v18, %v447_v20  ;;  %v180_v62 = vsel %vm95_vm14, %v179_v17, %v155_v58  ;;  %v47_v18 = vpop.permute.xlu0 %46 }
  0xb8   :  { %v375_v36 = vshrl.u32 %v357_v37, %v373_v24  ;;  %v378_v41 = vadd.s32 127, %v377_v25  ;;  %v161_v38 = vclz %v952_v31  ;;  %v451_v37 = vsel %vm439_vm2, %v433_v14, %v450_v40 }
  0xb9   :  { %v452_v59 = vsel %vm438_vm5, %v449_v43, %v451_v37  ;;  %v1318_v60 = vmul.u32.u64.low %v1263_v46, %v448_v33  ;;  %v1319_v61 = vmul.u32.u64.high %v1263_v46, %v448_v33, %v1318_v60  ;;  %v149_v1 = vadd.s32 %v1232_v13, %v1238_v19 }
  0xba   :  { %v376_v52 = vor.u32 %v375_v36, %v374_v30  ;;  %v379_v32 = vshll.u32 %v378_v41, 23  ;;  %v953_v56 = vadd.s32 4294967294, %v161_v38  ;;  %v444_v54 = vsel %vm438_vm5, %v441_v48, %v443_v35 }
  0xbb   :  { %v1324_v63 = vmul.u32.u64.low %v1263_v46, %v452_v59  ;;  %v1325_v49 = vmul.u32.u64.high %v1263_v46, %v452_v59, %v1324_v63  ;;  %v955_v2 = vadd.s32 4294967169, %v201_v3  ;;  %v390_v6 = vsel %vm1289_vm1, 0, %v1280_v8 }
  0xbc   :  { %v380_v42 = vor.u32 4788187, %v379_v32  ;;  %vm954_vm6 = vcmp.lt.s32.totalorder %v953_v56, 0  ;;  %v383_v5 = vcvt.s32.f32 %v376_v52  ;;  %v182_v58 = vsel %vm1298_vm4, 0, %v180_v62 }
  0xbd   :  { %v164_v7 = vsel %vm954_vm6, 0, %v953_v56  ;;  %v463_v17 = vadd.s32 1, %v1319_v61  ;;  %v460_v13 = vmul.u32 %v1263_v46, %v444_v54  ;;  %vm462_vm7 = vc.u32 %v1325_v49, %v1318_v60 }
  0xbe   :  { %v381_v4 = vand.u32 2147483647, %v380_v42  ;;  %v165_v12 = vsub.s32 32, %v164_v7  ;;  %v169_v14 = vsub.s32 4294967266, %v164_v7  ;;  %v207_v19 = vadd.s32 1, %v955_v2 }
  0xbf   :  { %v166_v3 = vshll.u32 %v1283_v11, %v164_v7  ;;  %v464_v8 = vsel %vm462_vm7, %v463_v17, %v1319_v61  ;;  %v394_v25 = vadd.s32 3, %v390_v6  ;;  %v186_v34 = vadd.s32 3, %v182_v58 }
  0xc0   :  { %v384_v21 = vmul.f32 %v383_v5, %v381_v4  ;;  %v167_v22 = vshrl.u32 %v149_v1, %v165_v12  ;;  %v170_v23 = vadd.s32 127, %v169_v14  ;;  %v465_v29 = vadd.s32 %v464_v8, %v460_v13 }
  0xc1   :  { %vm208_vm8 = vcmp.gt.s32.totalorder %v207_v19, 0  ;;  %v204_v11 = vand.u32 8388607, %v197_v39  ;;  %v1347_v38 = vmul.f32 %v1142_v9, %v47_v18  ;;  %v1349_v48 = vand.u32 3, %v394_v25 }
  0xc2   :  { %v385_v24 = vxor.u32 2147483648, %v384_v21  ;;  %v168_v30 = vor.u32 %v167_v22, %v166_v3  ;;  %v171_v31 = vshll.u32 %v170_v23, 23  ;;  %v209_v43 = vsel %vm208_vm8, %v207_v19, 0 }
  0xc3   :  { %v466_v36 = vadd.s32 536870912, %v465_v29  ;;  %v211_v41 = vand.u32 31, %v209_v43  ;;  %vm407_vm9 = vcmp.lt.s32.totalorder %v1167_v28, 0  ;;  %v1352_v37 = vand.u32 3, %v186_v34 }
  0xc4   :  { %v386_v46 = vsel %vm303_vm13, %v385_v24, %v384_v21  ;;  %v172_v40 = vor.u32 4788187, %v171_v31  ;;  %v175_v33 = vcvt.s32.f32 %v168_v30  ;;  %v205_v59 = vor.u32 8388608, %v204_v11 }
  0xc5   :  { %v389_v20 = vsel %vm1289_vm1, %v1152_v15, %v386_v46  ;;  %v467_v35 = vshrl.u32 %v466_v36, 30  ;;  %v212_v52 = vsub.s32 32, %v211_v41  ;;  %v1357_v61 = vadd.f32 %v1147_v10, %v1260_v44 }
  0xc6   :  { %1027 = vcosq.f32 %v389_v20  ;;  %v173_v32 = vand.u32 2147483647, %v172_v40  ;;  %v1360_v62 = vadd.s32 %v1318_v60, %v1325_v49  ;;  %vm400_vm10 = vcmp.eq.s32.totalorder %v1349_v48, 2 }
  0xc7   :  { %1029 = vsinq.f32 %v389_v20  ;;  %v468_v56 = vshll.u32 %v467_v35, 30  ;;  %v215_v50 = vshrl.u32 %v1087_v51, %v212_v52  ;;  %v218_v63 = vshrl.u32 %v1088_v53, %v212_v52 }
  0xc8   :  { %v176_v42 = vmul.f32 %v175_v33, %v173_v32  ;;  %v221_v1 = vshrl.u32 %v1089_v55, %v212_v52  ;;  %v1367_v2 = vshrl.u32 %v209_v43, 5  ;;  %v214_v4 = vshll.u32 %v1086_v47, %v211_v41 }
  0xc9   :  { %v1365_v54 = vsub.s32 %v465_v29, %v468_v56  ;;  %v224_v5 = vshrl.u32 %v1090_v57, %v212_v52  ;;  %vm397_vm11 = vcmp.eq.s32.totalorder %v1349_v48, 0  ;;  %v491_v6 = vsub.s32 4, %v467_v35 }
  0xca   :  { %v177_v44 = vxor.u32 2147483648, %v176_v42  ;;  %v217_v60 = vshll.u32 %v1087_v51, %v211_v41  ;;  %v220_v49 = vshll.u32 %v1088_v53, %v211_v41  ;;  %vm396_vm12 = vcmp.lt.s32.totalorder %v1349_v48, 2 }
  0xcb   :  { %v471_v7 = vsub.s32 0, %v1365_v54  ;;  %v216_v12 = vor.u32 %v215_v50, %v214_v4  ;;  %v223_v14 = vshll.u32 %v1089_v55, %v211_v41  ;;  %v1377_v58 = vshll.u32 %v205_v59, 8 }
  0xcc   :  { %vm393_vm13 = vweird.f32 %v1152_v15  ;;  %v178_v17 = vsel %vm95_vm14, %v177_v44, %v176_v42  ;;  %v219_v21 = vor.u32 %v218_v63, %v217_v60  ;;  %v222_v13 = vor.u32 %v221_v1, %v220_v49 }
  0xcd   :  { %v227_v19 = vshrl.u32 %v1091_v0, %v212_v52  ;;  %v181_v3 = vsel %vm1298_vm4, %v1155_v16, %v178_v17  ;;  %v964_v22 = vmin.u32 %v471_v7, %v1365_v54  ;;  %v225_v23 = vor.u32 %v224_v5, %v223_v14 }
  0xce   :  { %v226_v8 = vshll.u32 %v1090_v57, %v211_v41  ;;  %1031 = vcosq.f32 %v181_v3  ;;  %v492_v24 = vsel %vm407_vm9, %v491_v6, %v467_v35  ;;  %v213_v25 = vshrl.u32 %v1086_v47, %v212_v52 }
  0xcf   :  { %vm229_vm14 = vcmp.lt.s32.totalorder %v1367_v2, 1  ;;  %1033 = vsinq.f32 %v181_v3  ;;  %vm1394_vm15 = vcmp.le.f32.partialorder %v405_v45, 0.7853982  ;;  %v473_v18 = vclz %v964_v22 }
  0xd0   :  { %v1028_v29 = vpop.eup %1027  ;;  %v228_v30 = vor.u32 %v227_v19, %v226_v8  ;;  %vm230_vm0 = vcmp.lt.s32.totalorder %v1367_v2, 2  ;;  %vm231_vm1 = vcmp.lt.s32.totalorder %v1367_v2, 3  ;;  %vm232_vm2 = vcmp.lt.s32.totalorder %v1367_v2, 4 }
  0xd1   :  { %v1030_v31 = vpop.eup %1029  ;;  %v401_v34 = vxor.u32 2147483648, %v1028_v29  ;;  %v237_v43 = vsel %vm229_vm14, %v216_v12, %v219_v21  ;;  %v965_v36 = vadd.s32 4294967294, %v473_v18  ;;  %v234_v11 = vsel %vm232_vm2, %v222_v13, 2102212464 }
  0xd2   :  { %v398_v46 = vxor.u32 2147483648, %v1030_v31  ;;  %v238_v45 = vsel %vm232_vm2, %v225_v23, 920167782  ;;  %v233_v20 = vsel %vm229_vm14, %v213_v25, %v216_v12  ;;  %v241_v35 = vsel %vm229_vm14, %v219_v21, %v222_v13 }
  0xd3   :  { %v402_v41 = vsel %vm400_vm10, %v401_v34, %v1030_v31  ;;  %v239_v40 = vsel %vm231_vm1, %v222_v13, %v238_v45  ;;  %vm966_vm3 = vcmp.lt.s32.totalorder %v965_v36, 0  ;;  %v242_v33 = vsel %vm232_vm2, %v228_v30, 1326507024 }
  0xd4   :  { %v399_v52 = vsel %vm397_vm11, %v1028_v29, %v398_v46  ;;  %v240_v32 = vsel %vm230_vm0, %v237_v43, %v239_v40  ;;  %v476_v59 = vsel %vm966_vm3, 0, %v965_v36  ;;  %v235_v50 = vsel %vm231_vm1, %v219_v21, %v234_v11 }
  0xd5   :  { %v403_v56 = vsel %vm396_vm12, %v399_v52, %v402_v41  ;;  %v243_v42 = vsel %vm231_vm1, %v225_v23, %v242_v33  ;;  %vm185_vm4 = vweird.f32 %v1155_v16  ;;  %v477_v1 = vsub.s32 32, %v476_v59 }
  0xd6   :  { %v404_v63 = vsel %vm393_vm13, nan, %v403_v56  ;;  %v478_v4 = vshll.u32 %v1365_v54, %v476_v59  ;;  %v481_v5 = vsub.s32 4294967266, %v476_v59  ;;  %v244_v48 = vsel %vm230_vm0, %v241_v35, %v243_v42 }
  0xd7   :  { %927 = vst [vmem:[#allocation2 + $0x10] sm:$0xff] %v404_v63  ;;  %v1428_v44 = vmul.u32.u64.low %v1377_v58, %v240_v32  ;;  %v1429_v6 = vmul.u32.u64.high %v1377_v58, %v240_v32, %v1428_v44  ;;  %v616_v60 = vand.u32 2139095040, %v1357_v61  ;;  %v479_v15 = vshrl.u32 %v1360_v62, %v477_v1 }
  0xd8   :  { %v482_v49 = vadd.s32 127, %v481_v5  ;;  %v1435_v7 = vmul.u32.u64.low %v1377_v58, %v244_v48  ;;  %v1436_v12 = vmul.u32.u64.high %v1377_v58, %v244_v48, %v1435_v7  ;;  %v1032_v54 = vpop.eup %1031  ;;  %vm188_vm5 = vcmp.lt.s32.totalorder %v1352_v37, 2 }
  0xd9   :  { %vm192_vm6 = vcmp.eq.s32.totalorder %v1352_v37, 2  ;;  %v494_v14 = vsel %vm1394_vm15, 0, %v492_v24  ;;  %v617_v17 = vshrl.u32 %v616_v60, 23  ;;  %v1034_v21 = vpop.eup %1033  ;;  %v193_v13 = vxor.u32 2147483648, %v1032_v54 }
  0xda   :  { %v480_v19 = vor.u32 %v479_v15, %v478_v4  ;;  %v483_v3 = vshll.u32 %v482_v49, 23  ;;  %v236_v62 = vsel %vm230_vm0, %v233_v20, %v235_v50  ;;  %v190_v22 = vxor.u32 2147483648, %v1034_v21 }
  0xdb   :  { %v255_v23 = vadd.s32 1, %v1429_v6  ;;  %v613_v8 = vand.u32 2147483647, %v1357_v61  ;;  %v971_v25 = vadd.s32 4294967169, %v617_v17  ;;  %vm189_vm7 = vcmp.eq.s32.totalorder %v1352_v37, 0 }
  0xdc   :  { %v194_v29 = vsel %vm192_vm6, %v193_v13, %v1034_v21  ;;  %v484_v18 = vor.u32 4788187, %v483_v3  ;;  %v498_v30 = vadd.s32 3, %v494_v14  ;;  %v191_v24 = vsel %vm189_vm7, %v1032_v54, %v190_v22 }
  0xdd   :  { %v252_v31 = vmul.u32 %v1377_v58, %v236_v62  ;;  %vm254_vm8 = vc.u32 %v1436_v12, %v1428_v44  ;;  %v623_v34 = vadd.s32 1, %v971_v25  ;;  %v195_v2 = vsel %vm188_vm5, %v191_v24, %v194_v29 }
  0xde   :  { %v485_v43 = vand.u32 2147483647, %v484_v18  ;;  %v487_v46 = vcvt.s32.f32 %v480_v19  ;;  %v256_v36 = vsel %vm254_vm8, %v255_v23, %v1429_v6  ;;  %v196_v11 = vsel %vm185_vm4, nan, %v195_v2 }
  0xdf   :  { %v257_v45 = vadd.s32 %v256_v36, %v252_v31  ;;  %v620_v41 = vand.u32 8388607, %v613_v8  ;;  %vm624_vm10 = vcmp.gt.s32.totalorder %v623_v34, 0  ;;  %925 = vst [vmem:[#allocation2] sm:$0xff] %v196_v11  ;;  %v1459_v40 = vadd.f32 %v1147_v10, %v1347_v38 }
  0xe0   :  { %v488_v58 = vmul.f32 %v487_v46, %v485_v43  ;;  %v625_v20 = vsel %vm624_vm10, %v623_v34, 0  ;;  %v1461_v32 = vand.u32 3, %v498_v30  ;;  %vm199_vm11 = vcmp.lt.s32.totalorder %v1247_v27, 0 }
  0xe1   :  { %v258_v37 = vadd.s32 536870912, %v257_v45  ;;  %v627_v35 = vand.u32 31, %v625_v20  ;;  %v621_v33 = vor.u32 8388608, %v620_v41  ;;  %v1466_v50 = vshrl.u32 %v625_v20, 5 }
  0xe2   :  { %v489_v52 = vxor.u32 2147483648, %v488_v58  ;;  %v512_v38 = vand.u32 2139095040, %v1459_v40  ;;  %v253_v62 = vadd.s32 %v1428_v44, %v1436_v12  ;;  %v509_v23 = vand.u32 2147483647, %v1459_v40 }
  0xe3   :  { %v259_v16 = vshrl.u32 %v258_v37, 30  ;;  %v628_v56 = vsub.s32 32, %v627_v35  ;;  %v630_v42 = vshll.u32 %v1086_v47, %v627_v35  ;;  %v633_v4 = vshll.u32 %v1087_v51, %v627_v35 }
  0xe4   :  { %v490_v59 = vsel %vm407_vm9, %v489_v52, %v488_v58  ;;  %v636_v5 = vshll.u32 %v1088_v53, %v627_v35  ;;  %v639_v49 = vshll.u32 %v1089_v55, %v627_v35  ;;  %v642_v17 = vshll.u32 %v1090_v57, %v627_v35 }
  0xe5   :  { %v493_v63 = vsel %vm1394_vm15, %v1167_v28, %v490_v59  ;;  %v260_v1 = vshll.u32 %v259_v16, 30  ;;  %v631_v48 = vshrl.u32 %v1087_v51, %v628_v56  ;;  %v634_v6 = vshrl.u32 %v1088_v53, %v628_v56 }
  0xe6   :  { %1035 = vcosq.f32 %v493_v63  ;;  %v637_v60 = vshrl.u32 %v1089_v55, %v628_v56  ;;  %v640_v26 = vshrl.u32 %v1090_v57, %v628_v56  ;;  %v283_v7 = vsub.s32 4, %v259_v16 }
  0xe7   :  { %1037 = vsinq.f32 %v493_v63  ;;  %v1478_v15 = vsub.s32 %v257_v45, %v260_v1  ;;  %v632_v54 = vor.u32 %v631_v48, %v630_v42  ;;  %v635_v14 = vor.u32 %v634_v6, %v633_v4 }
  0xe8   :  { %v638_v13 = vor.u32 %v637_v60, %v636_v5  ;;  %v641_v19 = vor.u32 %v640_v26, %v639_v49  ;;  %v643_v3 = vshrl.u32 %v1091_v0, %v628_v56  ;;  %vm504_vm9 = vcmp.eq.s32.totalorder %v1461_v32, 2 }
  0xe9   :  { %v263_v21 = vsub.s32 0, %v1478_v15  ;;  %v1488_v22 = vshll.u32 %v621_v33, 8  ;;  %v513_v25 = vshrl.u32 %v512_v38, 23  ;;  %vm501_vm12 = vcmp.eq.s32.totalorder %v1461_v32, 0 }
  0xea   :  { %vm1494_vm13 = vcmp.le.f32.partialorder %v197_v39, 0.7853982  ;;  %v644_v30 = vor.u32 %v643_v3, %v642_v17  ;;  %vm645_vm14 = vcmp.lt.s32.totalorder %v1466_v50, 1  ;;  %vm648_vm15 = vcmp.lt.s32.totalorder %v1466_v50, 4  ;;  %v62_v3 = vpop.permute.xlu1 %61 }
  0xeb   :  { %v956_v18 = vmin.u32 %v263_v21, %v1478_v15  ;;  %vm500_vm0 = vcmp.lt.s32.totalorder %v1461_v32, 2  ;;  %v284_v44 = vsel %vm199_vm11, %v283_v7, %v259_v16  ;;  %v629_v12 = vshrl.u32 %v1086_v47, %v628_v56 }
  0xec   :  { %v653_v39 = vsel %vm645_vm14, %v632_v54, %v635_v14  ;;  %v654_v24 = vsel %vm648_vm15, %v641_v19, 920167782  ;;  %vm497_vm1 = vweird.f32 %v1167_v28  ;;  %vm647_vm2 = vcmp.lt.s32.totalorder %v1466_v50, 3 }
  0xed   :  { %v265_v31 = vclz %v956_v18  ;;  %v650_v34 = vsel %vm648_vm15, %v638_v13, 2102212464  ;;  %v657_v2 = vsel %vm645_vm14, %v635_v14, %v638_v13  ;;  %vm646_vm3 = vcmp.lt.s32.totalorder %v1466_v50, 2 }
  0xee   :  { %v655_v43 = vsel %vm647_vm2, %v638_v13, %v654_v24  ;;  %v658_v46 = vsel %vm648_vm15, %v644_v30, 1326507024  ;;  %v967_v36 = vadd.s32 4294967169, %v513_v25  ;;  %v649_v45 = vsel %vm645_vm14, %v629_v12, %v632_v54 }
  0xef   :  { %v957_v11 = vadd.s32 4294967294, %v265_v31  ;;  %v656_v41 = vsel %vm646_vm3, %v653_v39, %v655_v43  ;;  %v659_v58 = vsel %vm647_vm2, %v641_v19, %v658_v46  ;;  %v651_v37 = vsel %vm647_vm2, %v635_v14, %v650_v34 }
  0xf0   :  { %v1036_v20 = vpop.eup %1035  ;;  %v660_v35 = vsel %vm646_vm3, %v657_v2, %v659_v58  ;;  %v1519_v52 = vmul.u32.u64.low %v1488_v22, %v656_v41  ;;  %v1520_v16 = vmul.u32.u64.high %v1488_v22, %v656_v41, %v1519_v52  ;;  %v516_v1 = vand.u32 8388607, %v509_v23 }
  0xf1   :  { %v1038_v33 = vpop.eup %1037  ;;  %v505_v56 = vxor.u32 2147483648, %v1036_v20  ;;  %vm958_vm4 = vcmp.lt.s32.totalorder %v957_v11, 0  ;;  %v1524_v59 = vmul.u32.u64.low %v1488_v22, %v660_v35  ;;  %v1525_v42 = vmul.u32.u64.high %v1488_v22, %v660_v35, %v1524_v59 }
  0xf2   :  { %v502_v38 = vxor.u32 2147483648, %v1038_v33  ;;  %v268_v63 = vsel %vm958_vm4, 0, %v957_v11  ;;  %v519_v4 = vadd.s32 1, %v967_v36  ;;  %v652_v60 = vsel %vm646_vm3, %v649_v45, %v651_v37 }
  0xf3   :  { %v506_v5 = vsel %vm504_vm9, %v505_v56, %v1038_v33  ;;  %v269_v48 = vsub.s32 32, %v268_v63  ;;  %v273_v6 = vsub.s32 4294967266, %v268_v63  ;;  %v286_v26 = vsel %vm1494_vm13, 0, %v284_v44 }
  0xf4   :  { %v503_v49 = vsel %vm501_vm12, %v1036_v20, %v502_v38  ;;  %v671_v7 = vadd.s32 1, %v1520_v16  ;;  %vm520_vm5 = vcmp.gt.s32.totalorder %v519_v4, 0  ;;  %v270_v14 = vshll.u32 %v1478_v15, %v268_v63 }
  0xf5   :  { %v507_v54 = vsel %vm500_vm0, %v503_v49, %v506_v5  ;;  %v271_v17 = vshrl.u32 %v253_v62, %v269_v48  ;;  %v274_v21 = vadd.s32 127, %v273_v6  ;;  %v668_v13 = vmul.u32 %v1488_v22, %v652_v60 }
  0xf6   :  { %v508_v50 = vsel %vm497_vm1, nan, %v507_v54  ;;  %vm670_vm6 = vc.u32 %v1525_v42, %v1519_v52  ;;  %v521_v19 = vsel %vm520_vm5, %v519_v4, 0  ;;  %v290_v62 = vadd.s32 3, %v286_v26 }
  0xf7   :  { %928 = vst [vmem:[#allocation2 + $0x18] sm:$0xff] %v508_v50  ;;  %v272_v25 = vor.u32 %v271_v17, %v270_v14  ;;  %v275_v18 = vshll.u32 %v274_v21, 23  ;;  %v672_v32 = vsel %vm670_vm6, %v671_v7, %v1520_v16  ;;  %v523_v44 = vand.u32 31, %v521_v19 }
  0xf8   :  { %v673_v30 = vadd.s32 %v672_v32, %v668_v13  ;;  %v517_v12 = vor.u32 8388608, %v516_v1  ;;  %v77_v28 = vmul.f32 %v1142_v9, %v62_v3  ;;  %v1548_v22 = vshrl.u32 %v521_v19, 5 }
  0xf9   :  { %v276_v15 = vor.u32 4788187, %v275_v18  ;;  %v279_v39 = vcvt.s32.f32 %v272_v25  ;;  %v524_v31 = vsub.s32 32, %v523_v44  ;;  %v526_v2 = vshll.u32 %v1086_v47, %v523_v44 }
  0xfa   :  { %v674_v24 = vadd.s32 536870912, %v673_v30  ;;  %v529_v43 = vshll.u32 %v1087_v51, %v523_v44  ;;  %v532_v46 = vshll.u32 %v1088_v53, %v523_v44  ;;  %v535_v41 = vshll.u32 %v1089_v55, %v523_v44 }
  0xfb   :  { %v277_v34 = vand.u32 2147483647, %v276_v15  ;;  %v527_v11 = vshrl.u32 %v1087_v51, %v524_v31  ;;  %v530_v45 = vshrl.u32 %v1088_v53, %v524_v31  ;;  %v533_v58 = vshrl.u32 %v1089_v55, %v524_v31 }
  0xfc   :  { %v675_v36 = vshrl.u32 %v674_v24, 30  ;;  %v536_v20 = vshrl.u32 %v1090_v57, %v524_v31  ;;  %v539_v37 = vshrl.u32 %v1091_v0, %v524_v31  ;;  %v538_v33 = vshll.u32 %v1090_v57, %v523_v44 }
  0xfd   :  { %v280_v9 = vmul.f32 %v279_v39, %v277_v34  ;;  %v528_v16 = vor.u32 %v527_v11, %v526_v2  ;;  %v531_v59 = vor.u32 %v530_v45, %v529_v43  ;;  %v534_v38 = vor.u32 %v533_v58, %v532_v46 }
  0xfe   :  { %v676_v35 = vshll.u32 %v675_v36, 30  ;;  %v537_v63 = vor.u32 %v536_v20, %v535_v41  ;;  %v1560_v1 = vand.u32 3, %v290_v62  ;;  %v1564_v5 = vshll.u32 %v517_v12, 8 }
  0xff   :  { %v281_v56 = vxor.u32 2147483648, %v280_v9  ;;  %v1567_v48 = vadd.f32 %v1147_v10, %v77_v28  ;;  %v540_v60 = vor.u32 %v539_v37, %v538_v33  ;;  %vm541_vm7 = vcmp.lt.s32.totalorder %v1548_v22, 1 }
 0x100   :  { %v1562_v4 = vsub.s32 %v673_v30, %v676_v35  ;;  %vm542_vm8 = vcmp.lt.s32.totalorder %v1548_v22, 2  ;;  %vm543_vm10 = vcmp.lt.s32.totalorder %v1548_v22, 3  ;;  %vm544_vm9 = vcmp.lt.s32.totalorder %v1548_v22, 4 }
 0x101   :  { %v282_v6 = vsel %vm199_vm11, %v281_v56, %v280_v9  ;;  %v546_v10 = vsel %vm544_vm9, %v534_v38, 2102212464  ;;  %v549_v7 = vsel %vm541_vm7, %v528_v16, %v531_v59  ;;  %v550_v54 = vsel %vm544_vm9, %v537_v63, 920167782 }
 0x102   :  { %v285_v49 = vsel %vm1494_vm13, %v1247_v27, %v282_v6  ;;  %v679_v26 = vsub.s32 0, %v1562_v4  ;;  %v525_v17 = vshrl.u32 %v1086_v47, %v524_v31  ;;  %v551_v29 = vsel %vm543_vm10, %v534_v38, %v550_v54 }
 0x103   :  { %1039 = vcosq.f32 %v285_v49  ;;  %v699_v21 = vsub.s32 4, %v675_v36  ;;  %v552_v50 = vsel %vm542_vm8, %v549_v7, %v551_v29  ;;  %v553_v13 = vsel %vm541_vm7, %v531_v59, %v534_v38 }
 0x104   :  { %1041 = vsinq.f32 %v285_v49  ;;  %v972_v14 = vmin.u32 %v679_v26, %v1562_v4  ;;  %v554_v19 = vsel %vm544_vm9, %v540_v60, 1326507024  ;;  %v545_v25 = vsel %vm541_vm7, %v525_v17, %v528_v16  ;;  %v57_v60 = vpop.permute.xlu0 %56 }
 0x105   :  { %v547_v18 = vsel %vm543_vm10, %v531_v59, %v546_v10  ;;  %v555_v32 = vsel %vm543_vm10, %v537_v63, %v554_v19  ;;  %v1596_v30 = vmul.u32.u64.low %v1564_v5, %v552_v50  ;;  %v1597_v44 = vmul.u32.u64.high %v1564_v5, %v552_v50, %v1596_v30  ;;  %v1059_v50 = vld [vmem:[%s1783_s1] ss:$0 sm:$0xff] }
 0x106   :  { %v681_v3 = vclz %v972_v14  ;;  %v824_v15 = vand.u32 2139095040, %v1567_v48  ;;  %vm1603_vm11 = vcmp.le.f32.partialorder %v613_v8, 0.7853982  ;;  %vm615_vm12 = vcmp.lt.s32.totalorder %v1357_v61, 0 }
 0x107   :  { %v556_v28 = vsel %vm542_vm8, %v553_v13, %v555_v32  ;;  %vm292_vm13 = vcmp.lt.s32.totalorder %v1560_v1, 2  ;;  %v700_v39 = vsel %vm615_vm12, %v699_v21, %v675_v36  ;;  %vm293_vm14 = vcmp.eq.s32.totalorder %v1560_v1, 0 }
 0x108   :  { %v973_v12 = vadd.s32 4294967294, %v681_v3  ;;  %v1614_v24 = vmul.u32.u64.low %v1564_v5, %v556_v28  ;;  %v1615_v31 = vmul.u32.u64.high %v1564_v5, %v556_v28, %v1614_v24  ;;  %v825_v34 = vshrl.u32 %v824_v15, 23 }
 0x109   :  { %vm296_vm15 = vcmp.eq.s32.totalorder %v1560_v1, 2  ;;  %v548_v8 = vsel %vm542_vm8, %v545_v25, %v547_v18  ;;  %v669_v2 = vadd.s32 %v1519_v52, %v1525_v42  ;;  %v567_v46 = vadd.s32 1, %v1597_v44 }
 0x10a   :  { %vm974_vm0 = vcmp.lt.s32.totalorder %v973_v12, 0  ;;  %v979_v36 = vadd.s32 4294967169, %v825_v34  ;;  %v702_v41 = vsel %vm1603_vm11, 0, %v700_v39  ;;  %v821_v9 = vand.u32 2147483647, %v1567_v48 }
 0x10b   :  { %v684_v43 = vsel %vm974_vm0, 0, %v973_v12  ;;  %v564_v22 = vmul.u32 %v1564_v5, %v548_v8  ;;  %vm566_vm1 = vc.u32 %v1615_v31, %v1596_v30  ;;  %v706_v59 = vadd.s32 3, %v702_v41  ;;  %v1060_v8 = vld [vmem:[%s1784_s2] ss:$0 sm:$0xff]  ;;  %s1092_s2 = smov [#allocation2]  }
 0x10c   :  { %v685_v11 = vsub.s32 32, %v684_v43  ;;  %v689_v45 = vsub.s32 4294967266, %v684_v43  ;;  %v686_v20 = vshll.u32 %v1562_v4, %v684_v43  ;;  %v831_v52 = vadd.s32 1, %v979_v36  ;;  %s938_s7 = sshll.u32 %s1092_s2, 4  ;;  %s939_s7 = int_to_ptr.vmem [resolvable:$true] %s938_s7 }
 0x10d   :  { %v1040_v58 = vpop.eup %1039  ;;  %v568_v33 = vsel %vm566_vm1, %v567_v46, %v1597_v44  ;;  %v828_v10 = vand.u32 8388607, %v821_v9  ;;  %vm289_vm3 = vweird.f32 %v1247_v27  ;;  %v76_v13 = vmul.f32 %v1059_v50, %v57_v60  ;;  %s1061_s8 = scalar_lea.vmem %s939_s7, 1024  ;;  %p1066_p1 = scmp.lt.s32.totalorder %s939_s7, %s939_s7 }
 0x10e   :  { %v1042_v42 = vpop.eup %1041  ;;  %v297_v37 = vxor.u32 2147483648, %v1040_v58  ;;  %v687_v35 = vshrl.u32 %v669_v2, %v685_v11  ;;  %v690_v16 = vadd.s32 127, %v689_v45  ;;  %v569_v38 = vadd.s32 %v568_v33, %v564_v22  ;;  %p1062_p0 = scmp.ne.s32.totalorder %s939_s7, %s1061_s8  ;;  %p1067_p2 = scmp.lt.s32.totalorder %s1061_s8, %s1061_s8 }
 0x10f   :  { %v294_v56 = vxor.u32 2147483648, %v1042_v42  ;;  %vm832_vm2 = vcmp.gt.s32.totalorder %v831_v52, 0  ;;  %v1646_v25 = vand.u32 3, %v706_v59  ;;  %v829_v18 = vor.u32 8388608, %v828_v10 }
 0x110   :  { %v298_v63 = vsel %vm296_vm15, %v297_v37, %v1042_v42  ;;  %v688_v4 = vor.u32 %v687_v35, %v686_v20  ;;  %v691_v6 = vshll.u32 %v690_v16, 23  ;;  %v833_v5 = vsel %vm832_vm2, %v831_v52, 0  ;;  %p1068_p3 = por %p1067_p2, %p1066_p1 }
 0x111   :  { %v295_v49 = vsel %vm293_vm14, %v1040_v58, %v294_v56  ;;  %v570_v26 = vadd.s32 536870912, %v569_v38  ;;  %v835_v7 = vand.u32 31, %v833_v5  ;;  %v834_v24 = vshrl.u32 %v833_v5, 5 }
 0x112   :  { %v299_v54 = vsel %vm292_vm13, %v295_v49, %v298_v63  ;;  %v692_v14 = vor.u32 4788187, %v691_v6  ;;  %v695_v3 = vcvt.s32.f32 %v688_v4  ;;  %v1660_v2 = vadd.f32 %v1060_v8, %v76_v13  ;;  %p1069_p4 = pnand %p1068_p3, %p1062_p0 }
 0x113   :  { %v300_v17 = vsel %vm289_vm3, nan, %v299_v54  ;;  %v1641_v29 = vshrl.u32 %v570_v26, 30  ;;  %v836_v21 = vsub.s32 32, %v835_v7  ;;  %v838_v1 = vshll.u32 %v1086_v47, %v835_v7 }
 0x114   :  { %926 = vst [vmem:[#allocation2 + $0x8] sm:$0xff] %v300_v17  ;;  %v693_v19 = vand.u32 2147483647, %v692_v14  ;;  %v841_v34 = vshll.u32 %v1087_v51, %v835_v7  ;;  %v844_v36 = vshll.u32 %v1088_v53, %v835_v7  ;;  %v847_v11 = vshll.u32 %v1089_v55, %v835_v7 }
 0x115   :  { %v572_v27 = vshll.u32 %v1641_v29, 30  ;;  %v839_v32 = vshrl.u32 %v1087_v51, %v836_v21  ;;  %v842_v15 = vshrl.u32 %v1088_v53, %v836_v21  ;;  %v845_v12 = vshrl.u32 %v1089_v55, %v836_v21 }
 0x116   :  { %v696_v44 = vmul.f32 %v695_v3, %v693_v19  ;;  %v848_v28 = vshrl.u32 %v1090_v57, %v836_v21  ;;  %v850_v58 = vshll.u32 %v1090_v57, %v835_v7  ;;  %v851_v20 = vshrl.u32 %v1091_v0, %v836_v21 }
 0x117   :  { %v1654_v39 = vsub.s32 %v569_v38, %v572_v27  ;;  %v840_v46 = vor.u32 %v839_v32, %v838_v1  ;;  %v843_v41 = vor.u32 %v842_v15, %v841_v34  ;;  %v846_v52 = vor.u32 %v845_v12, %v844_v36 }
 0x118   :  { %v697_v43 = vxor.u32 2147483648, %v696_v44  ;;  %v849_v42 = vor.u32 %v848_v28, %v847_v11  ;;  %v869_v37 = vshll.u32 %v829_v18, 8  ;;  %v852_v33 = vor.u32 %v851_v20, %v850_v58 }
 0x119   :  { %v575_v45 = vsub.s32 0, %v1654_v39  ;;  %v720_v56 = vand.u32 2139095040, %v1660_v2  ;;  %v837_v59 = vshrl.u32 %v1086_v47, %v836_v21  ;;  %vm853_vm4 = vcmp.lt.s32.totalorder %v834_v24, 1 }
 0x11a   :  { %v698_v22 = vsel %vm615_vm12, %v697_v43, %v696_v44  ;;  %vm854_vm5 = vcmp.lt.s32.totalorder %v834_v24, 2  ;;  %vm856_vm6 = vcmp.lt.s32.totalorder %v834_v24, 4  ;;  %v861_v63 = vsel %vm853_vm4, %v840_v46, %v843_v41 }
 0x11b   :  { %v701_v35 = vsel %vm1603_vm11, %v1357_v61, %v698_v22  ;;  %v968_v16 = vmin.u32 %v575_v45, %v1654_v39  ;;  %vm855_vm7 = vcmp.lt.s32.totalorder %v834_v24, 3  ;;  %v858_v4 = vsel %vm856_vm6, %v846_v52, 2102212464 }
 0x11c   :  { %1043 = vcosq.f32 %v701_v35  ;;  %v862_v6 = vsel %vm856_vm6, %v849_v42, 920167782  ;;  %v865_v5 = vsel %vm853_vm4, %v843_v41, %v846_v52  ;;  %v857_v60 = vsel %vm853_vm4, %v837_v59, %v840_v46 }
 0x11d   :  { %1045 = vsinq.f32 %v701_v35  ;;  %v577_v38 = vclz %v968_v16  ;;  %v863_v49 = vsel %vm855_vm7, %v846_v52, %v862_v6  ;;  %v866_v26 = vsel %vm856_vm6, %v852_v33, 1326507024 }
 0x11e   :  { %v859_v10 = vsel %vm855_vm7, %v843_v41, %v858_v4  ;;  %v864_v7 = vsel %vm854_vm5, %v861_v63, %v863_v49  ;;  %v867_v54 = vsel %vm855_vm7, %v849_v42, %v866_v26  ;;  %v721_v14 = vshrl.u32 %v720_v56, 23 }
 0x11f   :  { %v969_v62 = vadd.s32 4294967294, %v577_v38  ;;  %v868_v17 = vsel %vm854_vm5, %v865_v5, %v867_v54  ;;  %v1677_v21 = vmul.u32.u64.low %v869_v37, %v864_v7  ;;  %v1678_v50 = vmul.u32.u64.high %v869_v37, %v864_v7, %v1677_v21 }
 0x120   :  { %v565_v13 = vadd.s32 %v1596_v30, %v1615_v31  ;;  %v1683_v3 = vmul.u32.u64.low %v869_v37, %v868_v17  ;;  %v1684_v27 = vmul.u32.u64.high %v869_v37, %v868_v17, %v1683_v3  ;;  %v860_v32 = vsel %vm854_vm5, %v857_v60, %v859_v10 }
 0x121   :  { %vm970_vm8 = vcmp.lt.s32.totalorder %v969_v62, 0  ;;  %v975_v44 = vadd.s32 4294967169, %v721_v14  ;;  %vm705_vm10 = vweird.f32 %v1357_v61  ;;  %vm511_vm9 = vcmp.lt.s32.totalorder %v1459_v40, 0 }
 0x122   :  { %v580_v19 = vsel %vm970_vm8, 0, %v969_v62  ;;  %v879_v34 = vadd.s32 1, %v1678_v50  ;;  %vm712_vm11 = vcmp.eq.s32.totalorder %v1646_v25, 2  ;;  %v595_v8 = vsub.s32 4, %v1641_v29 }
 0x123   :  { %v581_v18 = vsub.s32 32, %v580_v19  ;;  %v585_v1 = vsub.s32 4294967266, %v580_v19  ;;  %v582_v15 = vshll.u32 %v1654_v39, %v580_v19  ;;  %v727_v30 = vadd.s32 1, %v975_v44 }
 0x124   :  { %v876_v43 = vmul.u32 %v869_v37, %v860_v32  ;;  %vm878_vm12 = vc.u32 %v1684_v27, %v1677_v21  ;;  %v717_v58 = vand.u32 2147483647, %v1660_v2  ;;  %vm709_vm14 = vcmp.eq.s32.totalorder %v1646_v25, 0 }
 0x125   :  { %v583_v12 = vshrl.u32 %v565_v13, %v581_v18  ;;  %v586_v28 = vadd.s32 127, %v585_v1  ;;  %v880_v39 = vsel %vm878_vm12, %v879_v34, %v1678_v50  ;;  %vm728_vm13 = vcmp.gt.s32.totalorder %v727_v30, 0 }
 0x126   :  { %v1044_v31 = vpop.eup %1043  ;;  %v881_v41 = vadd.s32 %v880_v39, %v876_v43  ;;  %v729_v52 = vsel %vm728_vm13, %v727_v30, 0  ;;  %vm708_vm15 = vcmp.lt.s32.totalorder %v1646_v25, 2  ;;  %v596_v59 = vsel %vm511_vm9, %v595_v8, %v1641_v29 }
 0x127   :  { %v1046_v24 = vpop.eup %1045  ;;  %v713_v46 = vxor.u32 2147483648, %v1044_v31  ;;  %v584_v36 = vor.u32 %v583_v12, %v582_v15  ;;  %v587_v11 = vshll.u32 %v586_v28, 23  ;;  %v731_v35 = vand.u32 31, %v729_v52 }
 0x128   :  { %v710_v45 = vxor.u32 2147483648, %v1046_v24  ;;  %v882_v37 = vadd.s32 536870912, %v881_v41  ;;  %v724_v4 = vand.u32 8388607, %v717_v58  ;;  %vm1710_vm0 = vcmp.le.f32.partialorder %v509_v23, 0.7853982 }
 0x129   :  { %v714_v20 = vsel %vm712_vm11, %v713_v46, %v1046_v24  ;;  %v588_v22 = vor.u32 4788187, %v587_v11  ;;  %v591_v56 = vcvt.s32.f32 %v584_v36  ;;  %v732_v6 = vsub.s32 32, %v731_v35 }
 0x12a   :  { %v711_v42 = vsel %vm709_vm14, %v1044_v31, %v710_v45  ;;  %v1704_v63 = vshrl.u32 %v882_v37, 30  ;;  %v598_v29 = vsel %vm1710_vm0, 0, %v596_v59  ;;  %v734_v62 = vshll.u32 %v1086_v47, %v731_v35 }
 0x12b   :  { %v715_v16 = vsel %vm708_vm15, %v711_v42, %v714_v20  ;;  %v589_v33 = vand.u32 2147483647, %v588_v22  ;;  %v735_v60 = vshrl.u32 %v1087_v51, %v732_v6  ;;  %v738_v26 = vshrl.u32 %v1088_v53, %v732_v6 }
 0x12c   :  { %v716_v38 = vsel %vm705_vm10, nan, %v715_v16  ;;  %v884_v61 = vshll.u32 %v1704_v63, 30  ;;  %v741_v10 = vshrl.u32 %v1089_v55, %v732_v6  ;;  %v744_v23 = vshrl.u32 %v1090_v57, %v732_v6 }
 0x12d   :  { %930 = vst [vmem:[#allocation2 + $0x28] sm:$0xff] %v716_v38  ;;  %v592_v5 = vmul.f32 %v591_v56, %v589_v33  ;;  %v725_v54 = vor.u32 8388608, %v724_v4  ;;  %v730_v14 = vshrl.u32 %v729_v52, 5  ;;  %v737_v17 = vshll.u32 %v1087_v51, %v731_v35 }
 0x12e   :  { %v1722_v7 = vsub.s32 %v881_v41, %v884_v61  ;;  %v736_v13 = vor.u32 %v735_v60, %v734_v62  ;;  %v740_v19 = vshll.u32 %v1088_v53, %v731_v35  ;;  %v743_v3 = vshll.u32 %v1089_v55, %v731_v35 }
 0x12f   :  { %v593_v49 = vxor.u32 2147483648, %v592_v5  ;;  %v739_v32 = vor.u32 %v738_v26, %v737_v17  ;;  %v746_v44 = vshll.u32 %v1090_v57, %v731_v35  ;;  %v747_v12 = vshrl.u32 %v1091_v0, %v732_v6 }
 0x130   :  { %v887_v1 = vsub.s32 0, %v1722_v7  ;;  %v742_v15 = vor.u32 %v741_v10, %v740_v19  ;;  %v745_v51 = vor.u32 %v744_v23, %v743_v3  ;;  %v602_v28 = vadd.s32 3, %v598_v29 }
 0x131   :  { %v594_v50 = vsel %vm511_vm9, %v593_v49, %v592_v5  ;;  %v733_v55 = vshrl.u32 %v1086_v47, %v732_v6  ;;  %v748_v34 = vor.u32 %v747_v12, %v746_v44  ;;  %vm749_vm1 = vcmp.lt.s32.totalorder %v730_v14, 1 }
 0x132   :  { %v597_v18 = vsel %vm1710_vm0, %v1459_v40, %v594_v50  ;;  %v980_v53 = vmin.u32 %v887_v1, %v1722_v7  ;;  %v765_v30 = vshll.u32 %v725_v54, 8  ;;  %vm751_vm2 = vcmp.lt.s32.totalorder %v730_v14, 3 }
 0x133   :  { %1047 = vcosq.f32 %v597_v18  ;;  %vm752_vm3 = vcmp.lt.s32.totalorder %v730_v14, 4  ;;  %v757_v8 = vsel %vm749_vm1, %v736_v13, %v739_v32  ;;  %v761_v24 = vsel %vm749_vm1, %v739_v32, %v742_v15 }
 0x134   :  { %1049 = vsinq.f32 %v597_v18  ;;  %v889_v31 = vclz %v980_v53  ;;  %v754_v43 = vsel %vm752_vm3, %v742_v15, 2102212464  ;;  %v758_v57 = vsel %vm752_vm3, %v745_v51, 920167782 }
 0x135   :  { %v762_v46 = vsel %vm752_vm3, %v748_v34, 1326507024  ;;  %vm750_vm4 = vcmp.lt.s32.totalorder %v730_v14, 2  ;;  %v759_v0 = vsel %vm751_vm2, %v742_v15, %v758_v57  ;;  %v603_v39 = vand.u32 3, %v602_v28 }
 0x136   :  { %v981_v36 = vadd.s32 4294967294, %v889_v31  ;;  %v763_v11 = vsel %vm751_vm2, %v745_v51, %v762_v46  ;;  %v753_v45 = vsel %vm749_vm1, %v733_v55, %v736_v13  ;;  %v760_v47 = vsel %vm750_vm4, %v757_v8, %v759_v0 }
 0x137   :  { %v764_v41 = vsel %vm750_vm4, %v761_v24, %v763_v11  ;;  %v755_v20 = vsel %vm751_vm2, %v739_v32, %v754_v43  ;;  %v1745_v37 = vmul.u32.u64.low %v765_v30, %v760_v47  ;;  %v1746_v35 = vmul.u32.u64.high %v765_v30, %v760_v47, %v1745_v37 }
 0x138   :  { %vm982_vm5 = vcmp.lt.s32.totalorder %v981_v36, 0  ;;  %v1742_v22 = vmul.u32.u64.low %v765_v30, %v764_v41  ;;  %v1743_v52 = vmul.u32.u64.high %v765_v30, %v764_v41, %v1742_v22  ;;  %v877_v16 = vadd.s32 %v1677_v21, %v1684_v27 }
 0x139   :  { %v892_v42 = vsel %vm982_vm5, 0, %v981_v36  ;;  %vm605_vm6 = vcmp.eq.s32.totalorder %v603_v39, 0  ;;  %v756_v38 = vsel %vm750_vm4, %v753_v45, %v755_v20  ;;  %vm608_vm7 = vcmp.eq.s32.totalorder %v603_v39, 2 }
 0x13a   :  { %v893_v33 = vsub.s32 32, %v892_v42  ;;  %v897_v56 = vsub.s32 4294967266, %v892_v42  ;;  %v894_v25 = vshll.u32 %v1722_v7, %v892_v42  ;;  %vm774_vm8 = vc.u32 %v1743_v52, %v1745_v37 }
 0x13b   :  { %v775_v62 = vadd.s32 1, %v1746_v35  ;;  %v772_v49 = vmul.u32 %v765_v30, %v756_v38  ;;  %vm604_vm10 = vcmp.lt.s32.totalorder %v603_v39, 2  ;;  %vm601_vm9 = vweird.f32 %v1459_v40 }
 0x13c   :  { %v895_v5 = vshrl.u32 %v877_v16, %v893_v33  ;;  %v898_v29 = vadd.s32 127, %v897_v56  ;;  %v907_v19 = vsub.s32 4, %v1704_v63  ;;  %vm823_vm11 = vcmp.lt.s32.totalorder %v1567_v48, 0 }
 0x13d   :  { %v1048_v59 = vpop.eup %1047  ;;  %v776_v10 = vsel %vm774_vm8, %v775_v62, %v1746_v35  ;;  %vm822_vm12 = vcmp.le.f32.partialorder %v821_v9, 0.7853982  ;;  %vm913_vm1 = vweird.f32 %v1567_v48  ;;  %vm719_vm2 = vcmp.lt.s32.totalorder %v1660_v2, 0 }
 0x13e   :  { %v1050_v4 = vpop.eup %1049  ;;  %v609_v6 = vxor.u32 2147483648, %v1048_v59  ;;  %v896_v21 = vor.u32 %v895_v5, %v894_v25  ;;  %v899_v27 = vshll.u32 %v898_v29, 23  ;;  %v777_v54 = vadd.s32 %v776_v10, %v772_v49 }
 0x13f   :  { %v606_v61 = vxor.u32 2147483648, %v1050_v4  ;;  %v908_v44 = vsel %vm823_vm11, %v907_v19, %v1704_v63  ;;  %v773_v63 = vadd.s32 %v1745_v37, %v1743_v52  ;;  %vm718_vm3 = vcmp.le.f32.partialorder %v717_v58, 0.7853982 }
 0x140   :  { %v610_v60 = vsel %vm608_vm7, %v609_v6, %v1050_v4  ;;  %v900_v7 = vor.u32 4788187, %v899_v27  ;;  %v903_v50 = vcvt.s32.f32 %v896_v21  ;;  %v778_v13 = vadd.s32 536870912, %v777_v54 }
 0x141   :  { %v607_v26 = vsel %vm605_vm6, %v1048_v59, %v606_v61  ;;  %v910_v12 = vsel %vm822_vm12, 0, %v908_v44  ;;  %vm809_vm7 = vweird.f32 %v1660_v2 }
 0x142   :  { %v611_v23 = vsel %vm604_vm10, %v607_v26, %v610_v60  ;;  %v901_v17 = vand.u32 2147483647, %v900_v7  ;;  %v779_v18 = vshrl.u32 %v778_v13, 30  ;;  %v914_v55 = vadd.s32 3, %v910_v12 }
 0x143   :  { %v612_v14 = vsel %vm601_vm9, nan, %v611_v23 }
 0x144   :  { %929 = vst [vmem:[#allocation2 + $0x20] sm:$0xff] %v612_v14  ;;  %v904_v3 = vmul.f32 %v903_v50, %v901_v17  ;;  %v780_v32 = vshll.u32 %v779_v18, 30  ;;  %v915_v31 = vand.u32 3, %v914_v55  ;;  %v803_v33 = vsub.s32 4, %v779_v18 }
 0x146   :  { %v905_v1 = vxor.u32 2147483648, %v904_v3  ;;  %v781_v15 = vsub.s32 %v777_v54, %v780_v32  ;;  %vm920_vm14 = vcmp.eq.s32.totalorder %v915_v31, 2  ;;  %vm917_vm15 = vcmp.eq.s32.totalorder %v915_v31, 0 }
 0x147   :  { %vm916_vm0 = vcmp.lt.s32.totalorder %v915_v31, 2  ;;  %v804_v38 = vsel %vm719_vm2, %v803_v33, %v779_v18 }
 0x148   :  { %v906_v40 = vsel %vm823_vm11, %v905_v1, %v904_v3  ;;  %v783_v28 = vsub.s32 0, %v781_v15 }
 0x149   :  { %v909_v51 = vsel %vm822_vm12, %v1567_v48, %v906_v40  ;;  %v806_v48 = vsel %vm718_vm3, 0, %v804_v38 }
 0x14a   :  { %1051 = vcosq.f32 %v909_v51  ;;  %v976_v53 = vmin.u32 %v783_v28, %v781_v15  ;;  %v810_v6 = vadd.s32 3, %v806_v48 }
 0x14b   :  { %1053 = vsinq.f32 %v909_v51 }
 0x14c   :  { %v785_v34 = vclz %v976_v53  ;;  %v811_v25 = vand.u32 3, %v810_v6 }
 0x14e   :  { %v977_v30 = vadd.s32 4294967294, %v785_v34  ;;  %vm816_vm4 = vcmp.eq.s32.totalorder %v811_v25, 2  ;;  %vm813_vm5 = vcmp.eq.s32.totalorder %v811_v25, 0  ;;  %vm812_vm6 = vcmp.lt.s32.totalorder %v811_v25, 2 }
 0x150   :  { %vm978_vm13 = vcmp.lt.s32.totalorder %v977_v30, 0 }
 0x151   :  { %v788_v8 = vsel %vm978_vm13, 0, %v977_v30 }
 0x152   :  { %v789_v57 = vsub.s32 32, %v788_v8  ;;  %v793_v9 = vsub.s32 4294967266, %v788_v8  ;;  %v790_v0 = vshll.u32 %v781_v15, %v788_v8 }
 0x154   :  { %v1052_v43 = vpop.eup %1051  ;;  %v791_v11 = vshrl.u32 %v773_v63, %v789_v57  ;;  %v794_v39 = vadd.s32 127, %v793_v9 }
 0x155   :  { %v1054_v24 = vpop.eup %1053  ;;  %v921_v46 = vxor.u32 2147483648, %v1052_v43 }
 0x156   :  { %v918_v36 = vxor.u32 2147483648, %v1054_v24  ;;  %v792_v41 = vor.u32 %v791_v11, %v790_v0  ;;  %v795_v20 = vshll.u32 %v794_v39, 23 }
 0x157   :  { %v922_v45 = vsel %vm920_vm14, %v921_v46, %v1054_v24 }
 0x158   :  { %v919_v47 = vsel %vm917_vm15, %v1052_v43, %v918_v36  ;;  %v796_v52 = vor.u32 4788187, %v795_v20  ;;  %v799_v35 = vcvt.s32.f32 %v792_v41 }
 0x159   :  { %v923_v22 = vsel %vm916_vm0, %v919_v47, %v922_v45 }
 0x15a   :  { %v924_v42 = vsel %vm913_vm1, nan, %v923_v22  ;;  %v797_v37 = vand.u32 2147483647, %v796_v52 }
 0x15b   :  { %932 = vst [vmem:[#allocation2 + $0x38] sm:$0xff] %v924_v42 }
 0x15c   :  { %v800_v16 = vmul.f32 %v799_v35, %v797_v37 }
 0x15e   :  { %v801_v56 = vxor.u32 2147483648, %v800_v16 }
 0x160   :  { %v802_v59 = vsel %vm719_vm2, %v801_v56, %v800_v16 }
 0x161   :  { %v805_v4 = vsel %vm718_vm3, %v1660_v2, %v802_v59 }
 0x162   :  { %1055 = vcosq.f32 %v805_v4 }
 0x163   :  { %1057 = vsinq.f32 %v805_v4 }
 0x16c   :  { %v1056_v5 = vpop.eup %1055 }
 0x16d   :  { %v1058_v29 = vpop.eup %1057  ;;  %v817_v61 = vxor.u32 2147483648, %v1056_v5 }
 0x16e   :  { %v814_v62 = vxor.u32 2147483648, %v1058_v29 }
 0x16f   :  { %v818_v60 = vsel %vm816_vm4, %v817_v61, %v1058_v29 }
 0x170   :  { %v815_v58 = vsel %vm813_vm5, %v1056_v5, %v814_v62 }
 0x171   :  { %v819_v21 = vsel %vm812_vm6, %v815_v58, %v818_v60 }
 0x172   :  { %v820_v27 = vsel %vm809_vm7, nan, %v819_v21 }
 0x173   :  { %931 = vst [vmem:[#allocation2 + $0x30] sm:$0xff] %v820_v27 }
 0x174   :  { %1072 = shalt.err (!%p1069_p4)
}
 0x175   :  { %s1073_s11 = scalar_lea.hbm %s1785_s3, 1024 }
 0x176   :  { %p1074_p5 = scmp.ne.s32.totalorder %s1785_s3, %s1073_s11  ;;  %p1077_p6 = scmp.lt.u32.totalorder %s1073_s11, %s1785_s3 }
 0x178   :  { %p1079_p7 = pnand %p1077_p6, %p1074_p5 }
 0x17a   :  { %1082 = shalt.err (!%p1079_p7)
}
 0x17b   :  { %s1093_s16 = smov 128   ;;  %s1094_s17 = smov 8  }
 0x17c   :  { %944 = dma.vmem_to_hbm [thread:$0]  %s939_s7, 1024, %s1785_s3, [#allocation3], %s1093_s16, %s1093_s16, %s1094_s17  }
 0x17d   :  { %1083 = dma.done.wait [#allocation3], 1024  }
 0x17e   :  { %1084 = vsyncadd [#allocation3], 4294966272 }
 0x17f   :  { %948 = vsyncpa [#allocation3], 1 }

</bundles_post_ra>
